<compile_context>
chip_gen: v6e
topology: v6e:2x2x1
jax: 0.10.0
libtpu: 0.0.40
codegen_flags: <defaults>
</compile_context>

<pallas_src>
import functools

import jax
import jax.numpy as jnp
from jax.experimental import pallas as pl
from jax.experimental.pallas import tpu as pltpu

NODES = 64            # hidden width of the original PyTorch module
LANES = 128           # TPU lane width: action head padded to this for softmax
TILE_B_MAX = 1024     # max rows per grid step (safe in scoped VMEM everywhere)
SPLIT_MIN_B = 256     # above this, force >=2 tiles so v7x uses both TCs
NEG_BIG = -1e30       # effective -inf for padded logit lanes


def _round_up(x, m):
    return ((x + m - 1) // m) * m


def _cdiv(a, b):
    return -(-a // b)


def _choose_tiling(B):
    """Pick (tile_b, b_pad). Minimizes padded rows; guarantees >=2 tiles for
    mid/large batches so the 'parallel' batch axis spans both v7x TCs."""
    n_tiles = _cdiv(B, TILE_B_MAX)
    if B >= SPLIT_MIN_B and n_tiles < 2:
        n_tiles = 2
    if n_tiles == 1:
        tile_b = _round_up(B, 8)       # single full-extent tile (full-dim block)
        b_pad = tile_b
    else:
        tile_b = _round_up(_cdiv(B, n_tiles), 128)  # lane-dense transposed store
        b_pad = _round_up(B, tile_b)
    return tile_b, b_pad


# ---------------------------------------------------------------------------
# Kernel
# ---------------------------------------------------------------------------
def actor_c_kernel(obs_ref, w1_ref, b1_ref, w2_ref, b2_ref, w3_ref, b3_ref,
                   out_ref):
    # bf16 operands on the MXU, fp32 accumulation.
    x = obs_ref[...].astype(jnp.bfloat16)

    # FC1 + ReLU
    h1 = jnp.dot(x, w1_ref[...], preferred_element_type=jnp.float32) + b1_ref[...]
    h1 = jnp.maximum(h1, 0.0).astype(jnp.bfloat16)

    # FC2 + ReLU
    h2 = jnp.dot(h1, w2_ref[...], preferred_element_type=jnp.float32) + b2_ref[...]
    h2 = jnp.maximum(h2, 0.0).astype(jnp.bfloat16)

    # FC3 logits; b3 already contains the gumbel noise, padded lanes are -1e30.
    logits = jnp.dot(h2, w3_ref[...], preferred_element_type=jnp.float32) + b3_ref[...]

    # Numerically-stable softmax over the (lane-padded) action axis; padded
    # lanes underflow exp() to exactly 0.
    z = logits - jnp.max(logits, axis=-1, keepdims=True)
    e = jnp.exp(z)
    probs = e * pl.reciprocal(jnp.sum(e, axis=-1, keepdims=True), approx=True)

    # Store transposed: real action rows on the sublane axis, batch lane-dense.
    a_real = out_ref.shape[0]
    out_ref[...] = probs.T[:a_real, :]


# ---------------------------------------------------------------------------
# Wrapper
# ---------------------------------------------------------------------------
@functools.partial(jax.jit, static_argnames=("dim_action_c",))
def actor_c_forward(obs, prepared_params, gumbel, *, dim_action_c):
    """obs: [B, dim_observation] fp32 -> [B, dim_action_c] fp32 probabilities."""
    w1, b1, w2, b2, w3, b3 = prepared_params
    B, dim_obs = obs.shape
    a_pad = w3.shape[1]

    # Fold the per-call gumbel noise into the FC3 bias (padded lanes stay -1e30).
    g_pad = jnp.pad(gumbel.astype(jnp.float32),
                    ((0, 0), (0, a_pad - dim_action_c)))
    b3_eff = b3 + g_pad

    tile_b, b_pad = _choose_tiling(B)
    if b_pad != B:
        obs = jnp.pad(obs, ((0, b_pad - B), (0, 0)))
    grid = (b_pad // tile_b,)

    const = lambda i: (0, 0)     # weights / biases: DMA'd once, VMEM-resident
    row = lambda i: (i, 0)       # obs: streamed per batch tile
    col = lambda i: (0, i)       # transposed output: batch tiles on lane axis

    flops = 2 * b_pad * (dim_obs * NODES + NODES * NODES + NODES * a_pad)
    bytes_accessed = (
        b_pad * dim_obs * 4                              # obs read (fp32)
        + dim_action_c * b_pad * 4                       # transposed out write
        + (dim_obs * NODES + NODES * NODES + NODES * a_pad) * 2   # bf16 weights
        + (2 * NODES + a_pad) * 4)                       # fp32 biases

    out_t = pl.pallas_call(
        actor_c_kernel,
        out_shape=jax.ShapeDtypeStruct((dim_action_c, b_pad), jnp.float32),
        grid_spec=pltpu.PrefetchScalarGridSpec(
            num_scalar_prefetch=0,
            grid=grid,
            in_specs=[
                pl.BlockSpec((tile_b, dim_obs), row),
                pl.BlockSpec((dim_obs, NODES), const),
                pl.BlockSpec((1, NODES), const),
                pl.BlockSpec((NODES, NODES), const),
                pl.BlockSpec((1, NODES), const),
                pl.BlockSpec((NODES, a_pad), const),
                pl.BlockSpec((1, a_pad), const),
            ],
            out_specs=pl.BlockSpec((dim_action_c, tile_b), col),
        ),
        compiler_params=pltpu.CompilerParams(
            dimension_semantics=("parallel",),
            vmem_limit_bytes=32 * 1024 * 1024),
        cost_estimate=pl.CostEstimate(
            flops=flops,
            transcendentals=b_pad * a_pad,
            bytes_accessed=bytes_accessed),
    )(obs, w1, b1, w2, b2, w3, b3_eff)

    # Tiny [A, B] transpose back to [B, A] outside the kernel.
    return out_t[:, :B].T


# ---------------------------------------------------------------------------
# Parameter / noise construction (deterministic, mimics nn.Linear default init)
# ---------------------------------------------------------------------------
def init_params(key, dim_observation, dim_action_c):
    def linear(k, fan_in, fan_out):
        kw, kb = jax.random.split(k)
        bound = 1.0 / jnp.sqrt(fan_in)
        w = jax.random.uniform(kw, (fan_in, fan_out), jnp.float32, -bound, bound)
        b = jax.random.uniform(kb, (1, fan_out), jnp.float32, -bound, bound)
        return w, b

    k1, k2, k3 = jax.random.split(key, 3)
    w1, b1 = linear(k1, dim_observation, NODES)
    w2, b2 = linear(k2, NODES, NODES)
    w3, b3 = linear(k3, NODES, dim_action_c)
    return (w1, b1, w2, b2, w3, b3)


def prepare_params(params, dim_action_c):
    """One-time prep: cast weights to bf16 (MXU-native), lane-pad the action
    head to 128, set padded FC3 bias lanes to -1e30 so the softmax ignores
    them exactly. Biases stay fp32."""
    w1, b1, w2, b2, w3, b3 = params
    a_pad = _round_up(dim_action_c, LANES)

    w3p = jnp.zeros((NODES, a_pad), jnp.float32).at[:, :dim_action_c].set(w3)
    b3p = jnp.full((1, a_pad), NEG_BIG, jnp.float32).at[:, :dim_action_c].set(b3)
    return (w1.astype(jnp.bfloat16), b1.astype(jnp.float32),
            w2.astype(jnp.bfloat16), b2.astype(jnp.float32),
            w3p.astype(jnp.bfloat16), b3p)


def sample_gumbel(key, dim_action_c, eps=1e-20):
    # mirrors gumbel_sample: u ~ U(0,1); g = -log(-log(u + eps) + eps)
    # Single vector broadcast over the batch, matching the PyTorch reference.
    u = jax.random.uniform(key, (1, dim_action_c), jnp.float32)
    return -jnp.log(-jnp.log(u + eps) + eps)


def actor_c_reference(obs, params, gumbel):
    """Pure-JAX fp32 reference matching the PyTorch forward."""
    w1, b1, w2, b2, w3, b3 = params
    h1 = jax.nn.relu(obs @ w1 + b1)
    h2 = jax.nn.relu(h1 @ w2 + b2)
    logits = h2 @ w3 + b3
    return jax.nn.softmax(logits + gumbel, axis=-1)


if __name__ == "__main__":
    B = 8
    dim_observation = 32
    dim_action_c = 8

    key = jax.random.PRNGKey(0)
    k_obs, k_params, k_gumbel = jax.random.split(key, 3)

    obs = jax.random.normal(k_obs, (B, dim_observation), jnp.float32)
    params = init_params(k_params, dim_observation, dim_action_c)
    gumbel = sample_gumbel(k_gumbel, dim_action_c)

    prepared = prepare_params(params, dim_action_c)

    out = actor_c_forward(obs, prepared, gumbel, dim_action_c=dim_action_c)
    out = jax.block_until_ready(out)

    # Sanity: correct shape, rows are probability distributions, matches ref
    # (tolerances loosened for bf16 matmul operands + approx reciprocal).
    assert out.shape == (B, dim_action_c)
    assert jnp.allclose(jnp.sum(out, axis=-1), 1.0, atol=5e-3)
    ref = actor_c_reference(obs, params, gumbel)
    assert jnp.allclose(out, ref, atol=2e-2, rtol=2e-2)

    print("KERNEL_OK")
</pallas_src>

<mosaic_0001>
module attributes {stable_mosaic.version = 11 : i64} {
  func.func @actor_c_kernel(%arg0: i32, %arg1: memref<8x32xf32, #tpu.memory_space<vmem>>, %arg2: memref<32x64xbf16, #tpu.memory_space<vmem>>, %arg3: memref<1x64xf32, #tpu.memory_space<vmem>>, %arg4: memref<64x64xbf16, #tpu.memory_space<vmem>>, %arg5: memref<1x64xf32, #tpu.memory_space<vmem>>, %arg6: memref<64x128xbf16, #tpu.memory_space<vmem>>, %arg7: memref<1x128xf32, #tpu.memory_space<vmem>>, %arg8: memref<8x8xf32, #tpu.memory_space<vmem>>) attributes {dimension_semantics = [#tpu.dimension_semantics<parallel>], iteration_bounds = array<i64: 1>, scalar_prefetch = 0 : i64, scratch_operands = 0 : i64, tpu.core_type = #tpu.core_type<tc>, window_params = [{transform_indices = @transform_0, window_bounds = array<i64: 8, 32>}, {pipeline_mode = #tpu.pipeline_mode<synchronous>, transform_indices = @transform_1, window_bounds = array<i64: 32, 64>}, {pipeline_mode = #tpu.pipeline_mode<synchronous>, transform_indices = @transform_2, window_bounds = array<i64: 1, 64>}, {pipeline_mode = #tpu.pipeline_mode<synchronous>, transform_indices = @transform_3, window_bounds = array<i64: 64, 64>}, {pipeline_mode = #tpu.pipeline_mode<synchronous>, transform_indices = @transform_4, window_bounds = array<i64: 1, 64>}, {pipeline_mode = #tpu.pipeline_mode<synchronous>, transform_indices = @transform_5, window_bounds = array<i64: 64, 128>}, {pipeline_mode = #tpu.pipeline_mode<synchronous>, transform_indices = @transform_6, window_bounds = array<i64: 1, 128>}, {transform_indices = @transform_7, window_bounds = array<i64: 8, 8>}]} {
    %c0 = arith.constant 0 : index
    %c0_0 = arith.constant 0 : index
    %0 = vector.load %arg1[%c0, %c0_0] : memref<8x32xf32, #tpu.memory_space<vmem>>, vector<8x32xf32>
    %1 = arith.truncf %0 : vector<8x32xf32> to vector<8x32xbf16>
    %c0_1 = arith.constant 0 : index
    %c0_2 = arith.constant 0 : index
    %2 = vector.load %arg2[%c0_1, %c0_2] : memref<32x64xbf16, #tpu.memory_space<vmem>>, vector<32x64xbf16>
    %cst = arith.constant dense<0.000000e+00> : vector<8x64xf32>
    %3 = tpu.matmul %1, %2, %cst {dimension_numbers = #tpu.dot_dimension_numbers<[1], [0], [0], [1], [0, 0, 1, 1], [], []>} : vector<8x32xbf16>, vector<32x64xbf16>, vector<8x64xf32> -> vector<8x64xf32>
    %c0_3 = arith.constant 0 : index
    %c0_4 = arith.constant 0 : index
    %4 = vector.load %arg3[%c0_3, %c0_4] : memref<1x64xf32, #tpu.memory_space<vmem>>, vector<1x64xf32>
    %5 = vector.broadcast %4 : vector<1x64xf32> to vector<8x64xf32>
    %6 = arith.addf %3, %5 : vector<8x64xf32>
    %cst_5 = arith.constant 0.000000e+00 : f32
    %7 = vector.broadcast %cst_5 : f32 to vector<8x64xf32>
    %8 = arith.maximumf %6, %7 : vector<8x64xf32>
    %9 = arith.truncf %8 : vector<8x64xf32> to vector<8x64xbf16>
    %c0_6 = arith.constant 0 : index
    %c0_7 = arith.constant 0 : index
    %10 = vector.load %arg4[%c0_6, %c0_7] : memref<64x64xbf16, #tpu.memory_space<vmem>>, vector<64x64xbf16>
    %cst_8 = arith.constant dense<0.000000e+00> : vector<8x64xf32>
    %11 = tpu.matmul %9, %10, %cst_8 {dimension_numbers = #tpu.dot_dimension_numbers<[1], [0], [0], [1], [0, 0, 1, 1], [], []>} : vector<8x64xbf16>, vector<64x64xbf16>, vector<8x64xf32> -> vector<8x64xf32>
    %c0_9 = arith.constant 0 : index
    %c0_10 = arith.constant 0 : index
    %12 = vector.load %arg5[%c0_9, %c0_10] : memref<1x64xf32, #tpu.memory_space<vmem>>, vector<1x64xf32>
    %13 = vector.broadcast %12 : vector<1x64xf32> to vector<8x64xf32>
    %14 = arith.addf %11, %13 : vector<8x64xf32>
    %cst_11 = arith.constant 0.000000e+00 : f32
    %15 = vector.broadcast %cst_11 : f32 to vector<8x64xf32>
    %16 = arith.maximumf %14, %15 : vector<8x64xf32>
    %17 = arith.truncf %16 : vector<8x64xf32> to vector<8x64xbf16>
    %c0_12 = arith.constant 0 : index
    %c0_13 = arith.constant 0 : index
    %18 = vector.load %arg6[%c0_12, %c0_13] : memref<64x128xbf16, #tpu.memory_space<vmem>>, vector<64x128xbf16>
    %cst_14 = arith.constant dense<0.000000e+00> : vector<8x128xf32>
    %19 = tpu.matmul %17, %18, %cst_14 {dimension_numbers = #tpu.dot_dimension_numbers<[1], [0], [0], [1], [0, 0, 1, 1], [], []>} : vector<8x64xbf16>, vector<64x128xbf16>, vector<8x128xf32> -> vector<8x128xf32>
    %c0_15 = arith.constant 0 : index
    %c0_16 = arith.constant 0 : index
    %20 = vector.load %arg7[%c0_15, %c0_16] : memref<1x128xf32, #tpu.memory_space<vmem>>, vector<1x128xf32>
    %21 = vector.broadcast %20 : vector<1x128xf32> to vector<8x128xf32>
    %22 = arith.addf %19, %21 : vector<8x128xf32>
    %cst_17 = arith.constant dense<0xFF800000> : vector<8xf32>
    %23 = vector.multi_reduction <maximumf>, %22, %cst_17 [1] : vector<8x128xf32> to vector<8xf32>
    %24 = vector.shape_cast %23 : vector<8xf32> to vector<8x1xf32>
    %25 = vector.broadcast %24 : vector<8x1xf32> to vector<8x128xf32>
    %26 = arith.subf %22, %25 : vector<8x128xf32>
    %27 = math.exp %26 : vector<8x128xf32>
    %cst_18 = arith.constant dense<0.000000e+00> : vector<8xf32>
    %28 = vector.multi_reduction <add>, %27, %cst_18 [1] : vector<8x128xf32> to vector<8xf32>
    %29 = vector.shape_cast %28 : vector<8xf32> to vector<8x1xf32>
    %30 = tpu.reciprocal %29 {approx = true} : vector<8x1xf32> -> vector<8x1xf32>
    %31 = vector.broadcast %30 : vector<8x1xf32> to vector<8x128xf32>
    %32 = arith.mulf %27, %31 : vector<8x128xf32>
    %33 = tpu.transpose %32, [1, 0] : vector<8x128xf32> -> vector<128x8xf32>
    %34 = vector.extract_strided_slice %33 {offsets = [0, 0], sizes = [8, 8], strides = [1, 1]} : vector<128x8xf32> to vector<8x8xf32>
    %c0_19 = arith.constant 0 : index
    %c0_20 = arith.constant 0 : index
    %35 = vector.load %arg8[%c0_19, %c0_20] : memref<8x8xf32, #tpu.memory_space<vmem>>, vector<8x8xf32>
    tpu.vector_store %arg8[%c0_19, %c0_20], %34 {strides = array<i32>} : memref<8x8xf32, #tpu.memory_space<vmem>>, vector<8x8xf32>,
    return
  }
  func.func @transform_0(%arg0: i32) -> (i32, i32) {
    %c0_i32 = arith.constant 0 : i32
    %c0_i32_0 = arith.constant 0 : i32
    return %arg0, %c0_i32 : i32, i32
  }
  func.func @transform_1(%arg0: i32) -> (i32, i32) {
    %c0_i32 = arith.constant 0 : i32
    %c0_i32_0 = arith.constant 0 : i32
    %c0_i32_1 = arith.constant 0 : i32
    return %c0_i32, %c0_i32_0 : i32, i32
  }
  func.func @transform_2(%arg0: i32) -> (i32, i32) {
    %c0_i32 = arith.constant 0 : i32
    %c0_i32_0 = arith.constant 0 : i32
    %c0_i32_1 = arith.constant 0 : i32
    return %c0_i32, %c0_i32_0 : i32, i32
  }
  func.func @transform_3(%arg0: i32) -> (i32, i32) {
    %c0_i32 = arith.constant 0 : i32
    %c0_i32_0 = arith.constant 0 : i32
    %c0_i32_1 = arith.constant 0 : i32
    return %c0_i32, %c0_i32_0 : i32, i32
  }
  func.func @transform_4(%arg0: i32) -> (i32, i32) {
    %c0_i32 = arith.constant 0 : i32
    %c0_i32_0 = arith.constant 0 : i32
    %c0_i32_1 = arith.constant 0 : i32
    return %c0_i32, %c0_i32_0 : i32, i32
  }
  func.func @transform_5(%arg0: i32) -> (i32, i32) {
    %c0_i32 = arith.constant 0 : i32
    %c0_i32_0 = arith.constant 0 : i32
    %c0_i32_1 = arith.constant 0 : i32
    return %c0_i32, %c0_i32_0 : i32, i32
  }
  func.func @transform_6(%arg0: i32) -> (i32, i32) {
    %c0_i32 = arith.constant 0 : i32
    %c0_i32_0 = arith.constant 0 : i32
    %c0_i32_1 = arith.constant 0 : i32
    return %c0_i32, %c0_i32_0 : i32, i32
  }
  func.func @transform_7(%arg0: i32) -> (i32, i32) {
    %c0_i32 = arith.constant 0 : i32
    %c0_i32_0 = arith.constant 0 : i32
    return %c0_i32, %arg0 : i32, i32
  }
}

</mosaic_0001>

<bundles_post_ra>
// kernel: actor_c_forward.1
= control target key start
LH: loop header
LB: loop body
LE: loop exit
PB: predicated region body
PF: predicated region fallthrough
CT: control target
= control target key end

     0   :  { %12 = vsyncpa [#allocation3], 0  ;;  %s623_s0 = inlined_call_operand.hbm [shape: f32[8,32], index: 0, kind: input, shape index: {}]   ;;  %s624_s1 = inlined_call_operand.hbm [shape: bf16[32,64], index: 1, kind: input, shape index: {}]   ;;  %s625_s2 = inlined_call_operand.vmem [shape: f32[1,64], index: 2, kind: input, shape index: {}]   ;;  %s626_s3 = inlined_call_operand.hbm [shape: bf16[64,64], index: 3, kind: input, shape index: {}]   ;;  %s627_s4 = inlined_call_operand.vmem [shape: f32[1,64], index: 4, kind: input, shape index: {}]   ;;  %s628_s5 = inlined_call_operand.hbm [shape: bf16[64,128], index: 5, kind: input, shape index: {}]   ;;  %s629_s6 = inlined_call_operand.vmem [shape: f32[1,128], index: 6, kind: input, shape index: {}]   ;;  %s630_s7 = inlined_call_operand.vmem [shape: f32[8,8], index: 7, kind: output, shape index: {}]  }
   0x1   :  { %13 = vsyncpa [#allocation5], 0 }
   0x2   :  { %14 = vsyncpa [#allocation8], 0  ;;  %s537_s24 = smov [#allocation4]  }
   0x3   :  { %s30_s25 = sshll.u32 %s537_s24, 4  ;;  %s31_s25 = int_to_ptr.vmem [resolvable:$true] %s30_s25 }
   0x4   :  { %s459_s26 = scalar_lea.vmem %s31_s25, 256  ;;  %p464_p1 = scmp.lt.s32.totalorder %s31_s25, %s31_s25 }
   0x5   :  { %p460_p0 = scmp.ne.s32.totalorder %s31_s25, %s459_s26  ;;  %p465_p2 = scmp.lt.s32.totalorder %s459_s26, %s459_s26 }
   0x7   :  { %p466_p3 = por %p465_p2, %p464_p1 }
   0x9   :  { %p467_p4 = pnand %p466_p3, %p460_p0 }
   0xb   :  { %470 = shalt.err (!%p467_p4)
}
   0xc   :  { %s538_s27 = smov 64   ;;  %s539_s28 = smov 4  }
   0xd   :  { %36 = dma.hbm_to_vmem [thread:$0]  %s624_s1, 256, %s31_s25, [#allocation5], %s538_s27, %s538_s27, %s539_s28  }
   0xe   :  { %s540_s8 = smov [#allocation2]   ;;  %s541_s10 = smov [#allocation6]  }
   0xf   :  { %s21_s9 = sshll.u32 %s540_s8, 4  ;;  %s44_s11 = sshll.u32 %s541_s10, 4  ;;  %s22_s9 = int_to_ptr.vmem [resolvable:$true] %s21_s9  ;;  %s45_s11 = int_to_ptr.vmem [resolvable:$true] %s44_s11 }
  0x10   :  { %s479_s12 = scalar_lea.vmem %s22_s9, 128  ;;  %p484_p6 = scmp.lt.s32.totalorder %s22_s9, %s22_s9 }
  0x11   :  { %p480_p5 = scmp.ne.s32.totalorder %s22_s9, %s479_s12  ;;  %p485_p7 = scmp.lt.s32.totalorder %s479_s12, %s479_s12 }
  0x13   :  { %p486_p8 = por %p485_p7, %p484_p6 }
  0x15   :  { %p487_p9 = pnand %p486_p8, %p480_p5 }
  0x17   :  { %490 = shalt.err (!%p487_p9)
}
  0x18   :  { %24 = dma.hbm_to_vmem [thread:$0]  %s623_s0, 128, %s22_s9, [#allocation3]  }
  0x19   :  { %s499_s15 = scalar_lea.vmem %s45_s11, 512  ;;  %p504_p11 = scmp.lt.s32.totalorder %s45_s11, %s45_s11 }
  0x1a   :  { %p500_p10 = scmp.ne.s32.totalorder %s45_s11, %s499_s15  ;;  %p505_p12 = scmp.lt.s32.totalorder %s499_s15, %s499_s15 }
  0x1c   :  { %p506_p13 = por %p505_p12, %p504_p11 }
  0x1e   :  { %p507_p0 = pnand %p506_p13, %p500_p10 }
  0x20   :  { %510 = shalt.err (!%p507_p0)
}
  0x21   :  { %50 = dma.hbm_to_vmem [thread:$0]  %s626_s3, 512, %s45_s11, [#allocation5], %s538_s27, %s538_s27, %s539_s28  }
  0x22   :  { %s542_s17 = smov [#allocation7]  }
  0x23   :  { %s58_s18 = sshll.u32 %s542_s17, 4  ;;  %s59_s18 = int_to_ptr.vmem [resolvable:$true] %s58_s18 }
  0x24   :  { %s519_s19 = scalar_lea.vmem %s59_s18, 512  ;;  %p524_p2 = scmp.lt.s32.totalorder %s59_s18, %s59_s18 }
  0x25   :  { %p520_p1 = scmp.ne.s32.totalorder %s59_s18, %s519_s19  ;;  %p525_p3 = scmp.lt.s32.totalorder %s519_s19, %s519_s19 }
  0x27   :  { %p526_p4 = por %p525_p3, %p524_p2 }
  0x29   :  { %p527_p5 = pnand %p526_p4, %p520_p1 }
  0x2b   :  { %530 = shalt.err (!%p527_p5)
}
  0x2c   :  { %64 = dma.hbm_to_vmem [thread:$0]  %s628_s5, 512, %s59_s18, [#allocation8], %s538_s27, %s538_s27, %s539_s28  }
  0x2d   :  { %531 = dma.done.wait [#allocation3], 128  }
  0x2e   :  { %532 = vsyncadd [#allocation3], 4294967168 }
  0x2f   :  { %533 = dma.done.wait [#allocation5], 768  }
  0x30   :  { %534 = vsyncadd [#allocation5], 4294966528 }
  0x31   :  { %535 = dma.done.wait [#allocation8], 512  }
  0x32   :  { %536 = vsyncadd [#allocation8], 4294966784  ;;  %v543_v0 = vmov 0.0   ;;  %vm544_vm0 = vmmov 0   ;;  %v437_v1 = vld [vmem:[#allocation4 + $0x8] sm:$0xff]   ;;  %v438_v2 = vld [vmem:[#allocation4] sm:$0xff]  }
  0x33   :  { %397 = vmatprep.subr.bf16.mxu0 %v543_v0  ;;  %401 = vmatprep.mubr.msk.bf16.mxu0 %vm544_vm0, %v543_v0  ;;  %v80_v3 = vld [vmem:[#allocation2] sm:$0xff]  ;;  %v439_v4 = vld [vmem:[#allocation6 + $0x18] sm:$0xff]   ;;  %vm105_vm1 = vcmask 261120   ;;  %v440_v5 = vld [vmem:[#allocation6 + $0x10] sm:$0xff]   ;;  %vm190_vm2 = vcmask 523264   ;;  %vm359_vm3 = vcmask 64512  }
  0x34   :  { %405 = vmatprep.subr.bf16.mxu1 %v543_v0  ;;  %413 = vmatprep.mubr.msk.bf16.mxu1 %vm544_vm0, %v543_v0  ;;  %v81_v6 = vpack.c.bf16 %v80_v3, %v80_v3  ;;  %v441_v7 = vld [vmem:[#allocation6 + $0x8] sm:$0xff]   ;;  %v442_v8 = vld [vmem:[#allocation6] sm:$0xff]   ;;  %v443_v9 = vld [vmem:[#allocation7 + $0x18] sm:$0xff]  }
  0x35   :  { %398 = vmatpush3.bf16.msra.mxu0 %v437_v1  ;;  %406 = vmatpush3.bf16.msra.mxu1 %v439_v4  ;;  %v444_v10 = vld [vmem:[#allocation7 + $0x10] sm:$0xff]   ;;  %v368_v11 = vld [vmem:[%s625_s2] ss:$0 sm:$0xff]  ;;  %v446_v20 = vld [vmem:[#allocation7] sm:$0xff]  }
  0x36   :  { %399 = vmatprep.subr.bf16.mxu0 %v543_v0  ;;  %407 = vmatprep.subr.bf16.mxu1 %v543_v0  ;;  %v445_v19 = vld [vmem:[#allocation7 + $0x8] sm:$0xff]  }
  0x37   :  { %v372_v21 = vld [vmem:[%s627_s4] ss:$0 sm:$0xff] }
  0x38   :  { %v378_v29 = vld [vmem:[%s629_s6] ss:$0 sm:$0xff] }
  0x39   :  { %400 = vmatpush3.bf16.msra.mxu0 %v438_v2  ;;  %408 = vmatpush3.bf16.msra.mxu1 %v440_v5 }
  0x3a   :  { %417 = vmatprep.subr.bf16.mxu0 %v543_v0  ;;  %409 = vmatprep.subr.bf16.mxu1 %v543_v0 }
  0x3c   :  { %402 = vmatmul.mubr.msk.bf16.vlgmr.msra.gmra.mxu0 %vm105_vm1, %v81_v6 }
  0x3d   :  { %425 = vmatprep.mubr.msk.bf16.mxu0 %vm544_vm0, %v543_v0  ;;  %410 = vmatpush3.bf16.msra.mxu1 %v441_v7 }
  0x3e   :  { %411 = vmatprep.subr.bf16.mxu1 %v543_v0  ;;  %418 = vmatpush3.bf16.msra.mxu0 %v443_v9 }
  0x3f   :  { %419 = vmatprep.subr.bf16.mxu0 %v543_v0 }
  0x41   :  { %412 = vmatpush3.bf16.msra.mxu1 %v442_v8 }
  0x42   :  { %420 = vmatpush3.bf16.msra.mxu0 %v444_v10 }
  0x43   :  { %421 = vmatprep.subr.bf16.mxu0 %v543_v0 }
  0x46   :  { %422 = vmatpush3.bf16.msra.mxu0 %v445_v19 }
  0x47   :  { %423 = vmatprep.subr.bf16.mxu0 %v543_v0 }
  0x4a   :  { %424 = vmatpush3.bf16.msra.mxu0 %v446_v20 }
  0xfc   :  { %v143_v12 = vpop.f32.mrf.mxu0 }
  0xfd   :  { %v144_v13 = vadd.f32 %v368_v11, %v143_v12 }
  0xfe   :  { %v403_v14 = vpop.f32.mrf.mxu0 }
  0xff   :  { %v149_v15 = vmax.f32 %v144_v13, 0.0 }
 0x100   :  { %v146_v16 = vpop.f32.mrf.mxu0 }
 0x101   :  { %v150_v17 = vpack.c.bf16 %v149_v15, %v149_v15 }
 0x102   :  { %v404_v18 = vpop.f32.mrf.mxu0 }
 0x103   :  { %414 = vmatmul.mubr.msk.bf16.vlgmr.msra.gmra.mxu1 %vm190_vm2, %v150_v17 }
 0x1c3   :  { %v228_v22 = vpop.f32.mrf.mxu1 }
 0x1c4   :  { %v229_v23 = vadd.f32 %v372_v21, %v228_v22 }
 0x1c5   :  { %v415_v24 = vpop.f32.mrf.mxu1 }
 0x1c6   :  { %v234_v25 = vmax.f32 %v229_v23, 0.0 }
 0x1c7   :  { %v231_v26 = vpop.f32.mrf.mxu1 }
 0x1c8   :  { %v235_v27 = vpack.c.bf16 %v234_v25, %v234_v25 }
 0x1c9   :  { %v416_v28 = vpop.f32.mrf.mxu1 }
 0x1ca   :  { %426 = vmatmul.mubr.msk.bf16.vlgmr.msra.gmra.mxu0 %vm190_vm2, %v235_v27 }
 0x28a   :  { %v312_v30 = vpop.f32.mrf.mxu0 }
 0x28b   :  { %v313_v31 = vadd.f32 %v378_v29, %v312_v30 }
 0x28c   :  { %v427_v32 = vpop.f32.mrf.mxu0 }
 0x28d   :  { %318 = vmax.xlane.f32.xlu0 %v313_v31 }
 0x28e   :  { %v315_v33 = vpop.f32.mrf.mxu0 }
 0x290   :  { %v428_v34 = vpop.f32.mrf.mxu0 }
 0x316   :  { %v319_v35 = vpop.xlane.xlu0 %318 }
 0x317   :  { %v320_v36 = vsub.f32 %v313_v31, %v319_v35 }
 0x319   :  { %v321_v37 = vmul.f32 1.442695, %v320_v36 }
 0x31b   :  { %447 = vpow2.f32 %v321_v37 }
 0x328   :  { %v448_v38 = vpop.eup %447 }
 0x329   :  { %323 = vadd.xlane.f32.xlu0 %v448_v38 }
 0x3b2   :  { %v324_v39 = vpop.xlane.xlu0 %323 }
 0x3b3   :  { %449 = vrcp.f32 %v324_v39 }
 0x3c0   :  { %v450_v40 = vpop.eup %449 }
 0x3c1   :  { %v326_v41 = vmul.f32 %v450_v40, %v448_v38 }
 0x3c3   :  { %327 = vxpose.xlu1.b32.start.end [1/1] (short) (narrow) %v326_v41, 8 }
 0x43f   :  { %v343_v42 = vpop.trf.xlu1 }
 0x440   :  { %360 = vst.msk [vmem:[%s630_s7] sm:$0xff] %vm359_vm3, %v343_v42 }
 0x441   :  { %365 = vsyncpa [#allocation3], 1 }
 0x442   :  { %366 = vsyncpa [#allocation5], 1 }
 0x443   :  { %367 = vsyncpa [#allocation8], 1 }

</bundles_post_ra>
